<compile_context>
chip_gen: v7x
topology: tpu7x:2x2x1
jax: 0.10.0
libtpu: 0.0.40
codegen_flags: <defaults>
</compile_context>

<pallas_src>
import jax
import jax.numpy as jnp
from jax.experimental import pallas as pl
from jax.experimental.pallas import tpu as pltpu

EPS = 1e-5
LANE = 128
SUBLANE = 8


def _round_up(x, m):
    return (x + m - 1) // m * m


# ---------------------------------------------------------------------------
# Pallas kernels
# ---------------------------------------------------------------------------
def conv_stats_kernel(p_ref, w_ref, y_ref, sum_ref, sqs_ref):
    """Per R-tile: y = patches @ w (MXU, f32 accumulate).  Also accumulates the
    per-channel sum and sum-of-squares across the (arbitrary) R grid axis so
    BatchNorm statistics stay global even though R is tiled."""
    @pl.when(pl.program_id(0) == 0)
    def _():
        sum_ref[...] = jnp.zeros_like(sum_ref)
        sqs_ref[...] = jnp.zeros_like(sqs_ref)

    y = jnp.dot(p_ref[...], w_ref[...], preferred_element_type=jnp.float32)
    y_ref[...] = y
    sum_ref[...] += jnp.sum(y, axis=0, keepdims=True)
    sqs_ref[...] += jnp.sum(y * y, axis=0, keepdims=True)


def bn_relu_kernel(y_ref, scale_ref, shift_ref, o_ref):
    """out = relu(y * scale + shift)  (folded BN affine)."""
    o_ref[...] = jnp.maximum(y_ref[...] * scale_ref[...] + shift_ref[...], 0.0)


def bn_add_relu_kernel(y_ref, scale_ref, shift_ref, r_ref, o_ref):
    """out = relu(y * scale + shift + residual)."""
    o_ref[...] = jnp.maximum(
        y_ref[...] * scale_ref[...] + shift_ref[...] + r_ref[...], 0.0)


# ---------------------------------------------------------------------------
# pallas_call wrappers
# ---------------------------------------------------------------------------
def _tile_rows(r):
    """Pick an R tile (<=512, multiple of 8) and the padded row count."""
    r_tile = min(512, _round_up(r, SUBLANE))
    r_pad = _round_up(r, r_tile)
    return r_tile, r_pad


def _conv_stats(patches, w_flat, r_tile, mm_dtype):
    rp, kp = patches.shape
    cp = w_flat.shape[1]
    return pl.pallas_call(
        conv_stats_kernel,
        out_shape=(jax.ShapeDtypeStruct((rp, cp), jnp.float32),
                   jax.ShapeDtypeStruct((1, cp), jnp.float32),
                   jax.ShapeDtypeStruct((1, cp), jnp.float32)),
        grid=(rp // r_tile,),
        in_specs=[pl.BlockSpec((r_tile, kp), lambda r: (r, 0)),
                  pl.BlockSpec((kp, cp), lambda r: (0, 0))],
        out_specs=(pl.BlockSpec((r_tile, cp), lambda r: (r, 0)),
                   pl.BlockSpec((1, cp), lambda r: (0, 0)),
                   pl.BlockSpec((1, cp), lambda r: (0, 0))),
        compiler_params=pltpu.CompilerParams(
            dimension_semantics=("arbitrary",)),
    )(patches.astype(mm_dtype), w_flat.astype(mm_dtype))


def _bn_relu(y, scale, shift, r_tile):
    rp, cp = y.shape
    return pl.pallas_call(
        bn_relu_kernel,
        out_shape=jax.ShapeDtypeStruct((rp, cp), jnp.float32),
        grid=(rp // r_tile,),
        in_specs=[pl.BlockSpec((r_tile, cp), lambda r: (r, 0)),
                  pl.BlockSpec((1, cp), lambda r: (0, 0)),
                  pl.BlockSpec((1, cp), lambda r: (0, 0))],
        out_specs=pl.BlockSpec((r_tile, cp), lambda r: (r, 0)),
        compiler_params=pltpu.CompilerParams(
            dimension_semantics=("parallel",)),
    )(y, scale, shift)


def _bn_add_relu(y, scale, shift, residual, r_tile):
    rp, cp = y.shape
    return pl.pallas_call(
        bn_add_relu_kernel,
        out_shape=jax.ShapeDtypeStruct((rp, cp), jnp.float32),
        grid=(rp // r_tile,),
        in_specs=[pl.BlockSpec((r_tile, cp), lambda r: (r, 0)),
                  pl.BlockSpec((1, cp), lambda r: (0, 0)),
                  pl.BlockSpec((1, cp), lambda r: (0, 0)),
                  pl.BlockSpec((r_tile, cp), lambda r: (r, 0))],
        out_specs=pl.BlockSpec((r_tile, cp), lambda r: (r, 0)),
        compiler_params=pltpu.CompilerParams(
            dimension_semantics=("parallel",)),
    )(y, scale, shift, residual)


# ---------------------------------------------------------------------------
# JAX glue: im2col (NHWC), padding, BN finalize, shortcut
# ---------------------------------------------------------------------------
def _im2col_3x3_nhwc(x, stride):
    """x: [N, H, W, C] -> patches [N*Ho*Wo, 9*C]  (pad=1, 3x3 kernel).
    Column order is (tap = kh*3+kw, channel)."""
    n, h, w, c = x.shape
    xp = jnp.pad(x, ((0, 0), (1, 1), (1, 1), (0, 0)))
    ho = (h + 2 - 3) // stride + 1
    wo = (w + 2 - 3) // stride + 1
    taps = []
    for kh in range(3):
        for kw in range(3):
            taps.append(xp[:, kh:kh + stride * (ho - 1) + 1:stride,
                              kw:kw + stride * (wo - 1) + 1:stride, :])
    patches = jnp.stack(taps, axis=3)                  # [N, Ho, Wo, 9, C]
    return patches.reshape(n * ho * wo, 9 * c), ho, wo


def _pad2(a, rows, cols):
    return jnp.pad(a, ((0, rows - a.shape[0]), (0, cols - a.shape[1])))


def _flatten_weight(w_oihw):
    """[Cout, Cin, 3, 3] -> [9*Cin, Cout], row order (kh, kw, cin)."""
    cout, cin = w_oihw.shape[0], w_oihw.shape[1]
    return jnp.transpose(w_oihw, (2, 3, 1, 0)).reshape(9 * cin, cout)


def _bn_scale_shift(s, sq, count, gamma_p, beta_p):
    """One-pass stats finalize (biased var = E[y^2] - mean^2), folded affine."""
    mean = s / count
    var = jnp.maximum(sq / count - mean * mean, 0.0)
    istd = jax.lax.rsqrt(var + EPS)
    scale = gamma_p * istd
    shift = beta_p - mean * scale
    return scale, shift


def basic_block_cifar_forward(x_nchw, params, in_planes, planes, stride,
                              option="A", mm_dtype=jnp.float32):
    """Pallas implementation of BasicBlockCifar.forward.  x: [N, Cin, H, W]."""
    n = x_nchw.shape[0]
    w1, g1, b1 = params["w1"], params["g1"], params["b1"]
    w2, g2, b2 = params["w2"], params["g2"], params["b2"]

    # NCHW -> NHWC once; everything inside is NHWC / rows layout.
    x = jnp.transpose(x_nchw, (0, 2, 3, 1))
    cp = _round_up(planes, LANE)                          # lane-dense channels

    # ----------------------- conv1 + bn1 + relu -----------------------------
    p1, ho, wo = _im2col_3x3_nhwc(x, stride)              # [R1, 9*Cin]
    r1 = p1.shape[0]
    k1p = _round_up(p1.shape[1], LANE)
    r_tile, r1p = _tile_rows(r1)
    p1 = _pad2(p1, r1p, k1p)
    w1f = _pad2(_flatten_weight(w1), k1p, cp)
    g1p = _pad2(g1.reshape(1, -1), 1, cp)
    b1p = _pad2(b1.reshape(1, -1), 1, cp)

    y1, s1, q1 = _conv_stats(p1, w1f, r_tile, mm_dtype)
    scale1, shift1 = _bn_scale_shift(s1, q1, r1, g1p, b1p)
    out1_rows = _bn_relu(y1, scale1, shift1, r_tile)      # [R1p, Cp]

    # rows (N, Ho, Wo order) -> NHWC spatial; drop padded rows / channels.
    out1 = out1_rows[:r1, :planes].reshape(n, ho, wo, planes)

    # ----------------------- shortcut (option 'A' / identity) ---------------
    if stride != 1 or in_planes != planes:
        pad_c = planes // 4
        sc = x[:, ::2, ::2, :]
        sc = jnp.pad(sc, ((0, 0), (0, 0), (0, 0), (pad_c, pad_c)))
        sc = jnp.pad(sc, ((0, 0), (0, 0), (0, 0), (0, cp - sc.shape[3])))
    else:
        sc = jnp.pad(x, ((0, 0), (0, 0), (0, 0), (0, cp - in_planes)))
    sc_rows = _pad2(sc.reshape(n * ho * wo, cp), r1p, cp)

    # ----------------------- conv2 + bn2 + add + relu -----------------------
    p2, _, _ = _im2col_3x3_nhwc(out1, 1)                  # [R2, 9*planes]
    r2 = p2.shape[0]                                      # == r1
    k2p = _round_up(p2.shape[1], LANE)
    p2 = _pad2(p2, r1p, k2p)
    w2f = _pad2(_flatten_weight(w2), k2p, cp)
    g2p = _pad2(g2.reshape(1, -1), 1, cp)
    b2p = _pad2(b2.reshape(1, -1), 1, cp)

    y2, s2, q2 = _conv_stats(p2, w2f, r_tile, mm_dtype)
    scale2, shift2 = _bn_scale_shift(s2, q2, r2, g2p, b2p)
    out_rows = _bn_add_relu(y2, scale2, shift2, sc_rows, r_tile)

    out = out_rows[:r2, :planes].reshape(n, ho, wo, planes)
    return jnp.transpose(out, (0, 3, 1, 2))               # back to NCHW


# ---------------------------------------------------------------------------
# Pure-JAX reference (mirrors the PyTorch forward, training-mode BN)
# ---------------------------------------------------------------------------
def reference_forward(x, params, in_planes, planes, stride):
    def conv(x, w, s):
        return jax.lax.conv_general_dilated(
            x, w, (s, s), ((1, 1), (1, 1)),
            dimension_numbers=("NCHW", "OIHW", "NCHW"))

    def bn(y, g, b):
        mean = y.mean(axis=(0, 2, 3), keepdims=True)
        var = ((y - mean) ** 2).mean(axis=(0, 2, 3), keepdims=True)
        return ((y - mean) / jnp.sqrt(var + EPS)) * g.reshape(1, -1, 1, 1) \
            + b.reshape(1, -1, 1, 1)

    out = jax.nn.relu(bn(conv(x, params["w1"], stride), params["g1"], params["b1"]))
    out = bn(conv(out, params["w2"], 1), params["g2"], params["b2"])
    if stride != 1 or in_planes != planes:
        sc = x[:, :, ::2, ::2]
        sc = jnp.pad(sc, ((0, 0), (planes // 4, planes // 4), (0, 0), (0, 0)))
    else:
        sc = x
    return jax.nn.relu(out + sc)


# ---------------------------------------------------------------------------
if __name__ == "__main__":
    # Small config exercising the option-A downsampling shortcut.
    N, in_planes, planes, H, W, stride = 2, 4, 8, 16, 16, 2

    key = jax.random.PRNGKey(0)
    k1, k2, k3, k4, k5, k6 = jax.random.split(key, 6)
    params = {
        "w1": 0.1 * jax.random.normal(k1, (planes, in_planes, 3, 3), jnp.float32),
        "g1": 1.0 + 0.1 * jax.random.normal(k2, (planes,), jnp.float32),
        "b1": 0.1 * jax.random.normal(k3, (planes,), jnp.float32),
        "w2": 0.1 * jax.random.normal(k4, (planes, planes, 3, 3), jnp.float32),
        "g2": 1.0 + 0.1 * jax.random.normal(k5, (planes,), jnp.float32),
        "b2": 0.1 * jax.random.normal(k6, (planes,), jnp.float32),
    }
    x = jax.random.normal(jax.random.PRNGKey(42), (N, in_planes, H, W), jnp.float32)

    ref = jax.block_until_ready(reference_forward(x, params, in_planes, planes, stride))

    # f32 MXU path — tight check
    out_f32 = jax.block_until_ready(
        basic_block_cifar_forward(x, params, in_planes, planes, stride,
                                  mm_dtype=jnp.float32))
    assert out_f32.shape == ref.shape == (N, planes, H // stride, W // stride)
    assert jnp.allclose(out_f32, ref, rtol=5e-4, atol=5e-4), "f32 path mismatch vs reference"

    # bf16 MXU path (fast MXU / half the DMA bytes on v5e/v6e/v7x) — loose check
    out_bf16 = jax.block_until_ready(
        basic_block_cifar_forward(x, params, in_planes, planes, stride,
                                  mm_dtype=jnp.bfloat16))
    assert jnp.allclose(out_bf16, ref, rtol=6e-2, atol=6e-2), "bf16 path mismatch vs reference"

    print("KERNEL_OK")
</pallas_src>

<mosaic_0001>
module attributes {stable_mosaic.version = 11 : i64} {
  func.func @conv_stats_kernel(%arg0: i32, %arg1: memref<128x128xf32, #tpu.memory_space<vmem>>, %arg2: memref<128x128xf32, #tpu.memory_space<vmem>>, %arg3: memref<128x128xf32, #tpu.memory_space<vmem>>, %arg4: memref<1x128xf32, #tpu.memory_space<vmem>>, %arg5: memref<1x128xf32, #tpu.memory_space<vmem>>) attributes {dimension_semantics = [#tpu.dimension_semantics<arbitrary>], iteration_bounds = array<i64: 1>, scalar_prefetch = 0 : i64, scratch_operands = 0 : i64, tpu.core_type = #tpu.core_type<tc>, window_params = [{transform_indices = @transform_0, window_bounds = array<i64: 128, 128>}, {pipeline_mode = #tpu.pipeline_mode<synchronous>, transform_indices = @transform_1, window_bounds = array<i64: 128, 128>}, {transform_indices = @transform_2, window_bounds = array<i64: 128, 128>}, {pipeline_mode = #tpu.pipeline_mode<synchronous>, transform_indices = @transform_3, window_bounds = array<i64: 1, 128>}, {pipeline_mode = #tpu.pipeline_mode<synchronous>, transform_indices = @transform_4, window_bounds = array<i64: 1, 128>}]} {
    %c0_i32 = arith.constant 0 : i32
    %0 = arith.cmpi eq, %arg0, %c0_i32 : i32
    %1 = arith.extui %0 : i1 to i32
    %c0_i32_0 = arith.constant 0 : i32
    %2 = arith.cmpi ne, %1, %c0_i32_0 : i32
    scf.if %2 {
      %cst_16 = arith.constant 0.000000e+00 : f32
      %18 = vector.broadcast %cst_16 : f32 to vector<1x128xf32>
      %c0_17 = arith.constant 0 : index
      %c0_18 = arith.constant 0 : index
      %19 = vector.load %arg4[%c0_17, %c0_18] : memref<1x128xf32, #tpu.memory_space<vmem>>, vector<1x128xf32>
      tpu.vector_store %arg4[%c0_17, %c0_18], %18 {strides = array<i32>} : memref<1x128xf32, #tpu.memory_space<vmem>>, vector<1x128xf32>,
      %cst_19 = arith.constant 0.000000e+00 : f32
      %20 = vector.broadcast %cst_19 : f32 to vector<1x128xf32>
      %c0_20 = arith.constant 0 : index
      %c0_21 = arith.constant 0 : index
      %21 = vector.load %arg5[%c0_20, %c0_21] : memref<1x128xf32, #tpu.memory_space<vmem>>, vector<1x128xf32>
      tpu.vector_store %arg5[%c0_20, %c0_21], %20 {strides = array<i32>} : memref<1x128xf32, #tpu.memory_space<vmem>>, vector<1x128xf32>,
    } else {
    }
    %c0 = arith.constant 0 : index
    %c0_1 = arith.constant 0 : index
    %3 = vector.load %arg1[%c0, %c0_1] : memref<128x128xf32, #tpu.memory_space<vmem>>, vector<128x128xf32>
    %c0_2 = arith.constant 0 : index
    %c0_3 = arith.constant 0 : index
    %4 = vector.load %arg2[%c0_2, %c0_3] : memref<128x128xf32, #tpu.memory_space<vmem>>, vector<128x128xf32>
    %cst = arith.constant dense<0.000000e+00> : vector<128x128xf32>
    %5 = tpu.matmul %3, %4, %cst {dimension_numbers = #tpu.dot_dimension_numbers<[1], [0], [0], [1], [0, 0, 1, 1], [], []>} : vector<128x128xf32>, vector<128x128xf32>, vector<128x128xf32> -> vector<128x128xf32>
    %c0_4 = arith.constant 0 : index
    %c0_5 = arith.constant 0 : index
    %6 = vector.load %arg3[%c0_4, %c0_5] : memref<128x128xf32, #tpu.memory_space<vmem>>, vector<128x128xf32>
    tpu.vector_store %arg3[%c0_4, %c0_5], %5 {strides = array<i32>} : memref<128x128xf32, #tpu.memory_space<vmem>>, vector<128x128xf32>,
    %c0_6 = arith.constant 0 : index
    %c0_7 = arith.constant 0 : index
    %7 = vector.load %arg4[%c0_6, %c0_7] : memref<1x128xf32, #tpu.memory_space<vmem>>, vector<1x128xf32>
    %cst_8 = arith.constant dense<0.000000e+00> : vector<128xf32>
    %8 = vector.multi_reduction <add>, %5, %cst_8 [0] : vector<128x128xf32> to vector<128xf32>
    %9 = vector.shape_cast %8 : vector<128xf32> to vector<1x128xf32>
    %10 = arith.addf %7, %9 : vector<1x128xf32>
    %c0_9 = arith.constant 0 : index
    %c0_10 = arith.constant 0 : index
    %11 = vector.load %arg4[%c0_9, %c0_10] : memref<1x128xf32, #tpu.memory_space<vmem>>, vector<1x128xf32>
    tpu.vector_store %arg4[%c0_9, %c0_10], %10 {strides = array<i32>} : memref<1x128xf32, #tpu.memory_space<vmem>>, vector<1x128xf32>,
    %c0_11 = arith.constant 0 : index
    %c0_12 = arith.constant 0 : index
    %12 = vector.load %arg5[%c0_11, %c0_12] : memref<1x128xf32, #tpu.memory_space<vmem>>, vector<1x128xf32>
    %13 = arith.mulf %5, %5 : vector<128x128xf32>
    %cst_13 = arith.constant dense<0.000000e+00> : vector<128xf32>
    %14 = vector.multi_reduction <add>, %13, %cst_13 [0] : vector<128x128xf32> to vector<128xf32>
    %15 = vector.shape_cast %14 : vector<128xf32> to vector<1x128xf32>
    %16 = arith.addf %12, %15 : vector<1x128xf32>
    %c0_14 = arith.constant 0 : index
    %c0_15 = arith.constant 0 : index
    %17 = vector.load %arg5[%c0_14, %c0_15] : memref<1x128xf32, #tpu.memory_space<vmem>>, vector<1x128xf32>
    tpu.vector_store %arg5[%c0_14, %c0_15], %16 {strides = array<i32>} : memref<1x128xf32, #tpu.memory_space<vmem>>, vector<1x128xf32>,
    return
  }
  func.func @transform_0(%arg0: i32) -> (i32, i32) {
    %c0_i32 = arith.constant 0 : i32
    %c0_i32_0 = arith.constant 0 : i32
    return %arg0, %c0_i32 : i32, i32
  }
  func.func @transform_1(%arg0: i32) -> (i32, i32) {
    %c0_i32 = arith.constant 0 : i32
    %c0_i32_0 = arith.constant 0 : i32
    %c0_i32_1 = arith.constant 0 : i32
    return %c0_i32, %c0_i32_0 : i32, i32
  }
  func.func @transform_2(%arg0: i32) -> (i32, i32) {
    %c0_i32 = arith.constant 0 : i32
    %c0_i32_0 = arith.constant 0 : i32
    return %arg0, %c0_i32 : i32, i32
  }
  func.func @transform_3(%arg0: i32) -> (i32, i32) {
    %c0_i32 = arith.constant 0 : i32
    %c0_i32_0 = arith.constant 0 : i32
    %c0_i32_1 = arith.constant 0 : i32
    return %c0_i32, %c0_i32_0 : i32, i32
  }
  func.func @transform_4(%arg0: i32) -> (i32, i32) {
    %c0_i32 = arith.constant 0 : i32
    %c0_i32_0 = arith.constant 0 : i32
    %c0_i32_1 = arith.constant 0 : i32
    return %c0_i32, %c0_i32_0 : i32, i32
  }
}

</mosaic_0001>

<bundles_post_ra>
// kernel: tpu_custom_call.1
= control target key start
LH: loop header
LB: loop body
LE: loop exit
PB: predicated region body
PF: predicated region fallthrough
CT: control target
= control target key end

     0   :  { %10 = vsyncpa [#allocation3], 0  ;;  %s742_s0 = inlined_call_operand.hbm [shape: f32[128,128], index: 0, kind: input, shape index: {}]   ;;  %s743_s1 = inlined_call_operand.hbm [shape: f32[128,128], index: 1, kind: input, shape index: {}]   ;;  %s744_s2 = inlined_call_operand.hbm [shape: f32[128,128], index: 2, kind: output, shape index: {0}]   ;;  %s745_s3 = inlined_call_operand.hbm [shape: f32[1,128], index: 3, kind: output, shape index: {1}]   ;;  %s746_s4 = inlined_call_operand.hbm [shape: f32[1,128], index: 4, kind: output, shape index: {2}]  }
   0x1   :  { %11 = vsyncpa [#allocation6], 0 }
   0x2   :  { %12 = vsyncpa [#allocation4], 0 }
   0x3   :  { %13 = vsyncpa [#allocation9], 0  ;;  %s614_s15 = smov [#allocation2]   ;;  %s496_s19 = scalar_lea.hbm %s742_s0, 2048 }
   0x4   :  { %s19_s16 = sshll.u32 %s614_s15, 4  ;;  %p497_p0 = scmp.ne.s32.totalorder %s742_s0, %s496_s19  ;;  %s20_s16 = int_to_ptr.vmem [resolvable:$true] %s19_s16 }
   0x5   :  { %p500_p1 = scmp.lt.u32.totalorder %s496_s19, %s742_s0 }
   0x7   :  { %p502_p2 = pnand %p500_p1, %p497_p0 }
   0x9   :  { %505 = shalt.err (!%p502_p2)
}
   0xa   :  { %s506_s24 = scalar_lea.vmem %s20_s16, 2048  ;;  %p511_p4 = scmp.lt.s32.totalorder %s20_s16, %s20_s16 }
   0xb   :  { %p507_p3 = scmp.ne.s32.totalorder %s20_s16, %s506_s24  ;;  %p512_p5 = scmp.lt.s32.totalorder %s506_s24, %s506_s24 }
   0xd   :  { %p513_p6 = por %p512_p5, %p511_p4 }
   0xf   :  { %p514_p7 = pnand %p513_p6, %p507_p3 }
  0x11   :  { %517 = shalt.err (!%p514_p7)
}
  0x12   :  { %s615_s25 = smov 128   ;;  %s616_s26 = smov 8  }
  0x13   :  { %25 = dma.hbm_to_vmem [thread:$0]  %s742_s0, 2048, %s20_s16, [#allocation3], %s615_s25, %s615_s25, %s616_s26  }
  0x14   :  { %s617_s29 = smov [#allocation5]   ;;  %s518_s7 = scalar_lea.hbm %s743_s1, 2048 }
  0x15   :  { %s31_s30 = sshll.u32 %s617_s29, 4  ;;  %p519_p8 = scmp.ne.s32.totalorder %s743_s1, %s518_s7  ;;  %s32_s30 = int_to_ptr.vmem [resolvable:$true] %s31_s30 }
  0x16   :  { %p522_p9 = scmp.lt.u32.totalorder %s518_s7, %s743_s1 }
  0x18   :  { %p524_p10 = pnand %p522_p9, %p519_p8 }
  0x1a   :  { %527 = shalt.err (!%p524_p10)
}
  0x1b   :  { %s528_s12 = scalar_lea.vmem %s32_s30, 2048  ;;  %p533_p12 = scmp.lt.s32.totalorder %s32_s30, %s32_s30 }
  0x1c   :  { %p529_p11 = scmp.ne.s32.totalorder %s32_s30, %s528_s12  ;;  %p534_p13 = scmp.lt.s32.totalorder %s528_s12, %s528_s12 }
  0x1e   :  { %p535_p0 = por %p534_p13, %p533_p12 }
  0x20   :  { %p536_p1 = pnand %p535_p0, %p529_p11 }
  0x22   :  { %539 = shalt.err (!%p536_p1)
}
  0x23   :  { %37 = dma.hbm_to_vmem [thread:$0]  %s743_s1, 2048, %s32_s30, [#allocation6], %s615_s25, %s615_s25, %s616_s26  }
  0x24   :  { %606 = dma.done.wait [#allocation3], 2048  }
  0x25   :  { %607 = vsyncadd [#allocation3], 4294965248 }
  0x26   :  { %608 = dma.done.wait [#allocation6], 2048  }
  0x27   :  { %609 = vsyncadd [#allocation6], 4294965248  ;;  %v66_v0 = vld [vmem:[#allocation5] sm:$0xff]  ;;  %v67_v1 = vld [vmem:[#allocation5 + $0x8] sm:$0xff]  ;;  %v618_v40 = vmov 0.0   ;;  %s619_s1 = smov [#allocation7]  }
  0x28   :  { %v68_v2 = vld [vmem:[#allocation5 + $0x10] sm:$0xff]  ;;  %v440_v3 = vpack.c.bf16 %v67_v1, %v66_v0  ;;  %v69_v4 = vld [vmem:[#allocation5 + $0x18] sm:$0xff]  ;;  %v70_v6 = vld [vmem:[#allocation5 + $0x20] sm:$0xff]  ;;  %48 = vst [vmem:[#allocation8] sm:$0x1] %v618_v40  ;;  %s312_s14 = sshll.u32 %s619_s1, 4  ;;  %s313_s14 = int_to_ptr.vmem [resolvable:$true] %s312_s14 }
  0x29   :  { %v444_v5 = vpack.c.bf16 %v69_v4, %v68_v2  ;;  %v71_v7 = vld [vmem:[#allocation5 + $0x28] sm:$0xff]  ;;  %v50_v9 = vld [vmem:[#allocation2] sm:$0xff]  ;;  %v72_v10 = vld [vmem:[#allocation5 + $0x30] sm:$0xff]  ;;  %49 = vst [vmem:[#allocation10] sm:$0x1] %v618_v40  ;;  %s540_s15 = scalar_lea.vmem %s313_s14, 2048  ;;  %p545_p3 = scmp.lt.s32.totalorder %s313_s14, %s313_s14 }
  0x2a   :  { %441 = vmatprep.subr.bf16.mxu0 %v440_v3  ;;  %472 = vmatprep.subr.bf16.mxu1 %v440_v3  ;;  %v448_v8 = vpack.c.bf16 %v71_v7, %v70_v6  ;;  %v73_v11 = vld [vmem:[#allocation5 + $0x38] sm:$0xff]  ;;  %v58_v12 = vld [vmem:[#allocation2 + $0x40] sm:$0xff]  ;;  %v75_v15 = vld [vmem:[#allocation5 + $0x48] sm:$0xff]  ;;  %p541_p2 = scmp.ne.s32.totalorder %s313_s14, %s540_s15  ;;  %p546_p4 = scmp.lt.s32.totalorder %s540_s15, %s540_s15 }
  0x2b   :  { %443 = vmatpush3.bf16.msra.mxu0 %v440_v3  ;;  %480 = vmatpush3.bf16.msra.mxu1 %v440_v3  ;;  %v452_v13 = vpack.c.bf16 %v73_v11, %v72_v10  ;;  %v74_v14 = vld [vmem:[#allocation5 + $0x40] sm:$0xff]  ;;  %v76_v17 = vld [vmem:[#allocation5 + $0x50] sm:$0xff]  ;;  %v77_v18 = vld [vmem:[#allocation5 + $0x58] sm:$0xff] }
  0x2c   :  { %445 = vmatprep.subr.bf16.mxu0 %v444_v5  ;;  %473 = vmatprep.subr.bf16.mxu1 %v444_v5  ;;  %v456_v16 = vpack.c.bf16 %v75_v15, %v74_v14  ;;  %v460_v19 = vpack.c.bf16 %v77_v18, %v76_v17  ;;  %v78_v20 = vld [vmem:[#allocation5 + $0x60] sm:$0xff]  ;;  %v79_v21 = vld [vmem:[#allocation5 + $0x68] sm:$0xff]  ;;  %v80_v23 = vld [vmem:[#allocation5 + $0x70] sm:$0xff]  ;;  %p547_p5 = por %p546_p4, %p545_p3 }
  0x2d   :  { %416 = vmatprep.mubr.f32.mxu0 %v50_v9  ;;  %428 = vmatprep.mubr.f32.mxu1 %v58_v12  ;;  %v464_v22 = vpack.c.bf16 %v79_v21, %v78_v20  ;;  %v81_v24 = vld [vmem:[#allocation5 + $0x78] sm:$0xff]  ;;  %v51_v26 = vld [vmem:[#allocation2 + $0x8] sm:$0xff]  ;;  %v52_v28 = vld [vmem:[#allocation2 + $0x10] sm:$0xff] }
  0x2e   :  { %v468_v25 = vpack.c.bf16 %v81_v24, %v80_v23  ;;  %v59_v27 = vld [vmem:[#allocation2 + $0x48] sm:$0xff]  ;;  %v60_v29 = vld [vmem:[#allocation2 + $0x50] sm:$0xff]  ;;  %v53_v30 = vld [vmem:[#allocation2 + $0x18] sm:$0xff]  ;;  %p548_p6 = pnand %p547_p5, %p541_p2 }
  0x2f   :  { %447 = vmatpush3.bf16.msra.mxu0 %v444_v5  ;;  %481 = vmatpush3.bf16.msra.mxu1 %v444_v5  ;;  %v61_v31 = vld [vmem:[#allocation2 + $0x58] sm:$0xff]  ;;  %v54_v32 = vld [vmem:[#allocation2 + $0x20] sm:$0xff]  ;;  %v55_v34 = vld [vmem:[#allocation2 + $0x28] sm:$0xff] }
  0x30   :  { %449 = vmatprep.subr.bf16.mxu0 %v448_v8  ;;  %474 = vmatprep.subr.bf16.mxu1 %v448_v8  ;;  %v62_v33 = vld [vmem:[#allocation2 + $0x60] sm:$0xff]  ;;  %v63_v35 = vld [vmem:[#allocation2 + $0x68] sm:$0xff]  ;;  %v56_v36 = vld [vmem:[#allocation2 + $0x30] sm:$0xff] }
  0x31   :  { %v64_v37 = vld [vmem:[#allocation2 + $0x70] sm:$0xff]  ;;  %v57_v38 = vld [vmem:[#allocation2 + $0x38] sm:$0xff] }
  0x32   :  { %v65_v39 = vld [vmem:[#allocation2 + $0x78] sm:$0xff] }
  0x33   :  { %451 = vmatpush3.bf16.msra.mxu0 %v448_v8  ;;  %482 = vmatpush3.bf16.msra.mxu1 %v448_v8 }
  0x34   :  { %453 = vmatprep.subr.bf16.mxu0 %v452_v13  ;;  %475 = vmatprep.subr.bf16.mxu1 %v452_v13 }
  0x37   :  { %455 = vmatpush3.bf16.msra.mxu0 %v452_v13  ;;  %483 = vmatpush3.bf16.msra.mxu1 %v452_v13 }
  0x38   :  { %457 = vmatprep.subr.bf16.mxu0 %v456_v16  ;;  %476 = vmatprep.subr.bf16.mxu1 %v456_v16 }
  0x3b   :  { %459 = vmatpush3.bf16.msra.mxu0 %v456_v16  ;;  %484 = vmatpush3.bf16.msra.mxu1 %v456_v16 }
  0x3c   :  { %461 = vmatprep.subr.bf16.mxu0 %v460_v19  ;;  %477 = vmatprep.subr.bf16.mxu1 %v460_v19 }
  0x3f   :  { %463 = vmatpush3.bf16.msra.mxu0 %v460_v19  ;;  %485 = vmatpush3.bf16.msra.mxu1 %v460_v19 }
  0x40   :  { %465 = vmatprep.subr.bf16.mxu0 %v464_v22  ;;  %478 = vmatprep.subr.bf16.mxu1 %v464_v22 }
  0x43   :  { %467 = vmatpush3.bf16.msra.mxu0 %v464_v22  ;;  %486 = vmatpush3.bf16.msra.mxu1 %v464_v22 }
  0x44   :  { %469 = vmatprep.subr.bf16.mxu0 %v468_v25  ;;  %479 = vmatprep.subr.bf16.mxu1 %v468_v25 }
  0x47   :  { %471 = vmatpush3.bf16.msra.mxu0 %v468_v25  ;;  %487 = vmatpush3.bf16.msra.mxu1 %v468_v25 }
  0x4a   :  { %417 = vmatmul.mubr.f32.vlgmr.msra.gmra.mrb[0].mxu0 %v51_v26  ;;  %429 = vmatmul.mubr.f32.vlgmr.msra.gmra.mrb[0].mxu1 %v59_v27 }
  0x4b   :  { %419 = vmatprep.mubr.f32.mxu0 %v52_v28  ;;  %431 = vmatprep.mubr.f32.mxu1 %v60_v29 }
  0x4e   :  { %420 = vmatmul.mubr.f32.gmra.mrb[2].mxu0 %v53_v30  ;;  %432 = vmatmul.mubr.f32.gmra.mrb[2].mxu1 %v61_v31 }
  0x4f   :  { %422 = vmatprep.mubr.f32.mxu0 %v54_v32  ;;  %434 = vmatprep.mubr.f32.mxu1 %v62_v33 }
  0x52   :  { %423 = vmatmul.mubr.f32.gmra.mrb[4].mxu0 %v55_v34  ;;  %435 = vmatmul.mubr.f32.gmra.mrb[4].mxu1 %v63_v35 }
  0x53   :  { %425 = vmatprep.mubr.f32.mxu0 %v56_v36  ;;  %437 = vmatprep.mubr.f32.mxu1 %v64_v37 }
  0x56   :  { %426 = vmatmul.mubr.f32.gmra.mrb[6].mxu0 %v57_v38  ;;  %438 = vmatmul.mubr.f32.gmra.mrb[6].mxu1 %v65_v39 }
 0x11d   :  { %v418_v41 = vpop.f32.mrb[0].mxu0  ;;  %v677_v42 = vpop.f32.mrb[0].mxu1 }
 0x11e   :  { %228 = vst [vmem:[#allocation7 + $0x8] sm:$0xff] %v418_v41  ;;  %v269_v43 = vmul.f32 %v418_v41, %v418_v41  ;;  %v148_v44 = vpop.f32.mrb[1].mxu0  ;;  %236 = vst [vmem:[#allocation7 + $0x48] sm:$0xff] %v677_v42  ;;  %v680_v45 = vpop.f32.mrb[1].mxu1 }
 0x11f   :  { %227 = vst [vmem:[#allocation7] sm:$0xff] %v148_v44  ;;  %v244_v46 = vadd.f32 %v418_v41, %v148_v44  ;;  %v268_v47 = vmul.f32 %v148_v44, %v148_v44  ;;  %235 = vst [vmem:[#allocation7 + $0x40] sm:$0xff] %v680_v45 }
 0x121   :  { %v284_v48 = vadd.f32 %v269_v43, %v268_v47  ;;  %v421_v49 = vpop.f32.mrb[2].mxu0  ;;  %v683_v50 = vpop.f32.mrb[2].mxu1 }
 0x122   :  { %230 = vst [vmem:[#allocation7 + $0x18] sm:$0xff] %v421_v49  ;;  %v158_v51 = vpop.f32.mrb[3].mxu0  ;;  %238 = vst [vmem:[#allocation7 + $0x58] sm:$0xff] %v683_v50  ;;  %v198_v52 = vpop.f32.mrb[3].mxu1  ;;  %v271_v55 = vmul.f32 %v421_v49, %v421_v49 }
 0x123   :  { %229 = vst [vmem:[#allocation7 + $0x10] sm:$0xff] %v158_v51  ;;  %v245_v53 = vadd.f32 %v244_v46, %v158_v51  ;;  %v270_v54 = vmul.f32 %v158_v51, %v158_v51  ;;  %237 = vst [vmem:[#allocation7 + $0x50] sm:$0xff] %v198_v52 }
 0x125   :  { %v285_v56 = vadd.f32 %v284_v48, %v270_v54  ;;  %v424_v57 = vpop.f32.mrb[4].mxu0  ;;  %v246_v58 = vadd.f32 %v421_v49, %v245_v53  ;;  %v436_v59 = vpop.f32.mrb[4].mxu1 }
 0x126   :  { %232 = vst [vmem:[#allocation7 + $0x28] sm:$0xff] %v424_v57  ;;  %v168_v60 = vpop.f32.mrb[5].mxu0  ;;  %240 = vst [vmem:[#allocation7 + $0x68] sm:$0xff] %v436_v59  ;;  %v208_v61 = vpop.f32.mrb[5].mxu1  ;;  %v273_v1 = vmul.f32 %v424_v57, %v424_v57 }
 0x127   :  { %231 = vst [vmem:[#allocation7 + $0x20] sm:$0xff] %v168_v60  ;;  %v247_v62 = vadd.f32 %v246_v58, %v168_v60  ;;  %v272_v63 = vmul.f32 %v168_v60, %v168_v60  ;;  %v286_v0 = vadd.f32 %v285_v56, %v271_v55  ;;  %239 = vst [vmem:[#allocation7 + $0x60] sm:$0xff] %v208_v61 }
 0x129   :  { %v287_v2 = vadd.f32 %v286_v0, %v272_v63  ;;  %v427_v3 = vpop.f32.mrb[6].mxu0  ;;  %v248_v4 = vadd.f32 %v424_v57, %v247_v62  ;;  %v439_v5 = vpop.f32.mrb[6].mxu1 }
 0x12a   :  { %234 = vst [vmem:[#allocation7 + $0x38] sm:$0xff] %v427_v3  ;;  %v178_v6 = vpop.f32.mrb[7].mxu0  ;;  %242 = vst [vmem:[#allocation7 + $0x78] sm:$0xff] %v439_v5  ;;  %v218_v7 = vpop.f32.mrb[7].mxu1 }
 0x12b   :  { %233 = vst [vmem:[#allocation7 + $0x30] sm:$0xff] %v178_v6  ;;  %v249_v8 = vadd.f32 %v248_v4, %v178_v6  ;;  %v274_v9 = vmul.f32 %v178_v6, %v178_v6  ;;  %v288_v10 = vadd.f32 %v287_v2, %v273_v1  ;;  %241 = vst [vmem:[#allocation7 + $0x70] sm:$0xff] %v218_v7 }
 0x12c   :  { %551 = shalt.err (!%p548_p6)
}
 0x12d   :  { %s552_s18 = scalar_lea.hbm %s744_s2, 2048 }
 0x12e   :  { %p553_p7 = scmp.ne.s32.totalorder %s744_s2, %s552_s18  ;;  %p556_p8 = scmp.lt.u32.totalorder %s552_s18, %s744_s2 }
 0x130   :  { %p558_p9 = pnand %p556_p8, %p553_p7 }
 0x132   :  { %561 = shalt.err (!%p558_p9)
}
 0x133   :  { %318 = dma.vmem_to_hbm [thread:$0]  %s313_s14, 2048, %s744_s2, [#allocation4], %s615_s25, %s615_s25, %s616_s26   ;;  %v275_v11 = vmul.f32 %v427_v3, %v427_v3  ;;  %v250_v12 = vadd.f32 %v427_v3, %v249_v8  ;;  %v289_v13 = vadd.f32 %v288_v10, %v274_v9  ;;  %v276_v14 = vmul.f32 %v680_v45, %v680_v45  ;;  %v243_v48 = vld [vmem:[#allocation8] sm:$0x1]  ;;  %v267_v51 = vld [vmem:[#allocation10] sm:$0x1] }
 0x134   :  { %v277_v17 = vmul.f32 %v677_v42, %v677_v42  ;;  %v278_v20 = vmul.f32 %v198_v52, %v198_v52  ;;  %v279_v23 = vmul.f32 %v683_v50, %v683_v50  ;;  %v280_v26 = vmul.f32 %v208_v61, %v208_v61  ;;  %s620_s2 = smov [#allocation8]   ;;  %s621_s26 = smov [#allocation10]  }
 0x135   :  { %v290_v15 = vadd.f32 %v289_v13, %v275_v11  ;;  %v251_v16 = vadd.f32 %v250_v12, %v680_v45  ;;  %v281_v29 = vmul.f32 %v436_v59, %v436_v59  ;;  %v282_v32 = vmul.f32 %v218_v7, %v218_v7  ;;  %s325_s25 = sshll.u32 %s620_s2, 4  ;;  %s335_s27 = sshll.u32 %s621_s26, 4  ;;  %s326_s25 = int_to_ptr.vmem [resolvable:$true] %s325_s25  ;;  %s710_s27 = int_to_ptr.vmem [resolvable:$true] %s335_s27 }
 0x136   :  { %v283_v35 = vmul.f32 %v439_v5, %v439_v5  ;;  %s562_s28 = scalar_lea.vmem %s326_s25, 16  ;;  %s566_s29 = scalar_lea.vmem %s326_s25, 32 }
 0x137   :  { %v291_v18 = vadd.f32 %v290_v15, %v276_v14  ;;  %v252_v19 = vadd.f32 %v677_v42, %v251_v16  ;;  %p563_p10 = scmp.ne.s32.totalorder %s326_s25, %s562_s28  ;;  %p567_p11 = scmp.lt.s32.totalorder %s326_s25, %s326_s25 }
 0x138   :  { %p568_p12 = scmp.lt.s32.totalorder %s566_s29, %s562_s28 }
 0x139   :  { %v253_v21 = vadd.f32 %v252_v19, %v198_v52  ;;  %v292_v22 = vadd.f32 %v291_v18, %v277_v17 }
 0x13a   :  { %p569_p13 = por %p568_p12, %p567_p11 }
 0x13b   :  { %v293_v24 = vadd.f32 %v292_v22, %v278_v20  ;;  %v254_v25 = vadd.f32 %v683_v50, %v253_v21 }
 0x13c   :  { %p570_p0 = pnand %p569_p13, %p563_p10 }
 0x13d   :  { %v255_v27 = vadd.f32 %v254_v25, %v208_v61  ;;  %v294_v28 = vadd.f32 %v293_v24, %v279_v23 }
 0x13f   :  { %v295_v30 = vadd.f32 %v294_v28, %v280_v26  ;;  %v256_v31 = vadd.f32 %v436_v59, %v255_v27 }
 0x141   :  { %v257_v33 = vadd.f32 %v256_v31, %v218_v7  ;;  %v296_v34 = vadd.f32 %v295_v30, %v281_v29 }
 0x143   :  { %v258_v36 = vadd.f32 %v439_v5, %v257_v33  ;;  %v297_v37 = vadd.f32 %v296_v34, %v282_v32 }
 0x145   :  { %v259_v38 = vrot.slane %v258_v36, 4  ;;  %v298_v39 = vadd.f32 %v297_v37, %v283_v35 }
 0x147   :  { %v260_v40 = vadd.f32 %v259_v38, %v258_v36  ;;  %v299_v41 = vrot.slane %v298_v39, 4 }
 0x149   :  { %v261_v42 = vrot.slane %v260_v40, 2  ;;  %v300_v43 = vadd.f32 %v299_v41, %v298_v39 }
 0x14b   :  { %v262_v44 = vadd.f32 %v261_v42, %v260_v40  ;;  %v301_v45 = vrot.slane %v300_v43, 2 }
 0x14d   :  { %v263_v46 = vrot.slane %v262_v44, 1  ;;  %v302_v47 = vadd.f32 %v301_v45, %v300_v43 }
 0x14f   :  { %v303_v49 = vrot.slane %v302_v47, 1  ;;  %v264_v50 = vadd.f32 %v263_v46, %v262_v44 }
 0x151   :  { %v265_v52 = vadd.f32 %v264_v50, %v243_v48  ;;  %v304_v53 = vadd.f32 %v303_v49, %v302_v47 }
 0x153   :  { %266 = vst [vmem:[#allocation8] sm:$0x1] %v265_v52  ;;  %v305_v54 = vadd.f32 %v304_v53, %v267_v51 }
 0x154   :  { %573 = shalt.err (!%p570_p0)
}
 0x155   :  { %s574_s6 = scalar_lea.hbm %s745_s3, 16 }
 0x156   :  { %p575_p1 = scmp.ne.s32.totalorder %s745_s3, %s574_s6  ;;  %p578_p2 = scmp.lt.u32.totalorder %s574_s6, %s745_s3 }
 0x158   :  { %p580_p3 = pnand %p578_p2, %p575_p1 }
 0x15a   :  { %583 = shalt.err (!%p580_p3)
}
 0x15b   :  { %328 = dma.vmem_to_hbm [thread:$0]  %s326_s25, 16, %s745_s3, [#allocation9]   ;;  %306 = vst [vmem:[#allocation10] sm:$0x1] %v305_v54 }
 0x15c   :  { %s584_s0 = scalar_lea.vmem %s710_s27, 16  ;;  %s588_s13 = scalar_lea.vmem %s710_s27, 32 }
 0x15d   :  { %p585_p4 = scmp.ne.s32.totalorder %s710_s27, %s584_s0  ;;  %p589_p5 = scmp.lt.s32.totalorder %s710_s27, %s710_s27 }
 0x15e   :  { %p590_p6 = scmp.lt.s32.totalorder %s588_s13, %s584_s0 }
 0x160   :  { %p591_p7 = por %p590_p6, %p589_p5 }
 0x162   :  { %p592_p8 = pnand %p591_p7, %p585_p4 }
 0x164   :  { %595 = shalt.err (!%p592_p8)
}
 0x165   :  { %s596_s15 = scalar_lea.hbm %s746_s4, 16 }
 0x166   :  { %p597_p9 = scmp.ne.s32.totalorder %s746_s4, %s596_s15  ;;  %p600_p10 = scmp.lt.u32.totalorder %s596_s15, %s746_s4 }
 0x168   :  { %p602_p11 = pnand %p600_p10, %p597_p9 }
 0x16a   :  { %605 = shalt.err (!%p602_p11)
}
 0x16b   :  { %338 = dma.vmem_to_hbm [thread:$0]  %s710_s27, 16, %s746_s4, [#allocation9]  }
 0x16c   :  { %610 = dma.done.wait [#allocation4], 2048  }
 0x16d   :  { %611 = vsyncadd [#allocation4], 4294965248 }
 0x16e   :  { %612 = dma.done.wait [#allocation9], 32  }
 0x16f   :  { %613 = vsyncadd [#allocation9], 4294967264 }
 0x170   :  { %348 = vsyncpa [#allocation3], 1 }
 0x171   :  { %349 = vsyncpa [#allocation6], 1 }
 0x172   :  { %350 = vsyncpa [#allocation4], 1 }
 0x173   :  { %351 = vsyncpa [#allocation9], 1 }

</bundles_post_ra>
